<compile_context>
chip_gen: v7x
topology: tpu7x:2x2x1
jax: 0.10.0
libtpu: 0.0.40
codegen_flags: <defaults>
</compile_context>

<pallas_src>
import functools

import jax
import jax.numpy as jnp
from jax import lax
from jax.experimental import pallas as pl
from jax.experimental.pallas import tpu as pltpu

EPS = 1e-5
NEG_INF = -1e9
VMEM_LIMIT_BYTES = 48 * 1024 * 1024   # fits v7x (64 MiB physical) with headroom


# ----------------------------- small helpers -----------------------------

def _row_tile(m, cap=128):
    """Largest multiple-of-8 divisor of m that is <= cap, preferring >=2 grid steps.

    Falls back to the whole extent when no such divisor exists (rare, awkward M)."""
    cands = [t for t in range(8, min(cap, m) + 1, 8) if m % t == 0]
    if not cands:
        return m
    multi = [t for t in cands if m // t >= 2]
    return max(multi) if multi else max(cands)


def _cparams(n_axes):
    return pltpu.CompilerParams(
        dimension_semantics=("parallel",) * n_axes,
        vmem_limit_bytes=VMEM_LIMIT_BYTES)


def _layer_norm_f32(y, g, b):
    mu = jnp.mean(y, axis=-1, keepdims=True)
    var = jnp.mean((y - mu) ** 2, axis=-1, keepdims=True)
    return (y - mu) * lax.rsqrt(var + EPS) * g + b


# ----------------------------- Pallas kernels -----------------------------

def _proj_kernel(x_ref, w_ref, b_ref, *o_refs):
    """y = x @ w + b; the n equal-width column chunks of y go to n separate outputs."""
    y = (jnp.dot(x_ref[...].astype(jnp.bfloat16), w_ref[...],
                 preferred_element_type=jnp.float32) + b_ref[...])
    f = y.shape[1] // len(o_refs)
    for i, o in enumerate(o_refs):
        o[...] = y[:, i * f:(i + 1) * f].astype(o.dtype)


def _ffn_add_ln_kernel(x_ref, w1_ref, b1_ref, w2_ref, b2_ref, g_ref, beta_ref, o_ref):
    """o = LayerNorm(relu(x @ w1 + b1) @ w2 + b2 + x)  -- fused FFN block."""
    x = x_ref[...]                                           # bf16
    h = (jnp.dot(x, w1_ref[...], preferred_element_type=jnp.float32) + b1_ref[...])
    h = jnp.maximum(h, 0.0)
    y = (jnp.dot(h.astype(jnp.bfloat16), w2_ref[...],
                 preferred_element_type=jnp.float32)
         + b2_ref[...] + x.astype(jnp.float32))
    o_ref[...] = _layer_norm_f32(y, g_ref[...], beta_ref[...]).astype(o_ref.dtype)


def _attn_heads(bias, q, k, v, attn_buf, psum_buf, scale, n_heads, head_dim,
                exact_recip):
    """Per-head masked softmax attention for one (batch, Lq-tile) step.

    q/k/v are bf16 (tq, F)/(Lk, F); each head's output is stored directly into the
    bf16 VMEM scratch `attn_buf`; probability sums (if requested) accumulate into
    the f32 VMEM scratch `psum_buf`."""
    for h in range(n_heads):                     # static unroll over heads
        lo = h * head_dim
        qh = q[:, lo:lo + head_dim]              # (tq, D) bf16
        kh = k[:, lo:lo + head_dim]              # (Lk, D) bf16
        vh = v[:, lo:lo + head_dim]              # (Lk, D) bf16
        # Contract last dims of both operands: no k transpose / relayout.
        s = lax.dot_general(qh, kh, (((1,), (1,)), ((), ())),
                            preferred_element_type=jnp.float32) * scale + bias
        m = jnp.max(s, axis=-1, keepdims=True)
        e = jnp.exp(s - m)
        denom = jnp.sum(e, axis=-1, keepdims=True)
        if exact_recip:
            p = e / denom
        else:
            p = e * pl.reciprocal(denom, approx=True)
        if psum_buf is not None:
            if h == 0:
                psum_buf[...] = p
            else:
                psum_buf[...] += p
        attn_buf[:, lo:lo + head_dim] = lax.dot_general(
            p.astype(jnp.bfloat16), vh, (((1,), (0,)), ((), ())),
            preferred_element_type=jnp.float32).astype(jnp.bfloat16)


def _attn_epilogue(attn_buf, res_ref, wo_ref, bo_ref, g_ref, beta_ref, o_ref):
    """o = LayerNorm(attn @ w_o + b_o + residual)  -- fused output projection."""
    y = (jnp.dot(attn_buf[...], wo_ref[...], preferred_element_type=jnp.float32)
         + bo_ref[...] + res_ref[0].astype(jnp.float32))
    o_ref[0] = _layer_norm_f32(y, g_ref[...], beta_ref[...]).astype(o_ref.dtype)


def _attn_kernel(bias_ref, q_ref, k_ref, v_ref, res_ref, wo_ref, bo_ref,
                 g_ref, beta_ref, o_ref, attn_buf, *, scale, n_heads, head_dim):
    _attn_heads(bias_ref[0], q_ref[0], k_ref[0], v_ref[0], attn_buf, None,
                scale, n_heads, head_dim, exact_recip=False)
    _attn_epilogue(attn_buf, res_ref, wo_ref, bo_ref, g_ref, beta_ref, o_ref)


def _attn_probs_kernel(bias_ref, q_ref, k_ref, v_ref, res_ref, wo_ref, bo_ref,
                       g_ref, beta_ref, o_ref, pmean_ref, attn_buf, psum_buf, *,
                       scale, n_heads, head_dim):
    _attn_heads(bias_ref[0], q_ref[0], k_ref[0], v_ref[0], attn_buf, psum_buf,
                scale, n_heads, head_dim, exact_recip=True)
    pmean_ref[0] = (psum_buf[...] * (1.0 / n_heads)).astype(pmean_ref.dtype)
    _attn_epilogue(attn_buf, res_ref, wo_ref, bo_ref, g_ref, beta_ref, o_ref)


# ----------------------------- Pallas wrappers -----------------------------

def linear_multi(x2d, w, b, n_out):
    """x2d: (M, K) bf16; w: (K, n_out*F) bf16; b: (1, n_out*F) f32.

    Returns a tuple of n_out separate (M, F) bf16 outputs (no wrapper column slices)."""
    M, K = x2d.shape
    NF = w.shape[1]
    F = NF // n_out
    tm = _row_tile(M)
    out_shape = tuple(jax.ShapeDtypeStruct((M, F), jnp.bfloat16) for _ in range(n_out))
    out_specs = tuple(pl.BlockSpec((tm, F), lambda i: (i, 0)) for _ in range(n_out))
    return pl.pallas_call(
        _proj_kernel,
        grid=(M // tm,),
        in_specs=[pl.BlockSpec((tm, K), lambda i: (i, 0)),
                  pl.BlockSpec((K, NF), lambda i: (0, 0)),
                  pl.BlockSpec((1, NF), lambda i: (0, 0))],
        out_specs=out_specs,
        out_shape=out_shape,
        compiler_params=_cparams(1),
    )(x2d, w, b)


def ffn_add_ln(x2d, ffn_p, ln):
    """LayerNorm(relu(x @ w1 + b1) @ w2 + b2 + x), fused, bf16 in/out."""
    M, F = x2d.shape
    d_ff = ffn_p["w1"].shape[1]
    tm = _row_tile(M)
    return pl.pallas_call(
        _ffn_add_ln_kernel,
        grid=(M // tm,),
        in_specs=[pl.BlockSpec((tm, F), lambda i: (i, 0)),
                  pl.BlockSpec((F, d_ff), lambda i: (0, 0)),
                  pl.BlockSpec((1, d_ff), lambda i: (0, 0)),
                  pl.BlockSpec((d_ff, F), lambda i: (0, 0)),
                  pl.BlockSpec((1, F), lambda i: (0, 0)),
                  pl.BlockSpec((1, F), lambda i: (0, 0)),
                  pl.BlockSpec((1, F), lambda i: (0, 0))],
        out_specs=pl.BlockSpec((tm, F), lambda i: (i, 0)),
        out_shape=jax.ShapeDtypeStruct((M, F), jnp.bfloat16),
        compiler_params=_cparams(1),
    )(x2d, ffn_p["w1"], ffn_p["b1"], ffn_p["w2"], ffn_p["b2"], ln["g"], ln["b"])


def attention_block(q, k, v, residual, key_padding_mask, w_o, b_o, ln, n_heads,
                    need_probs=False):
    """Fused multi-head attention + output projection + residual + LayerNorm.

    q: (B, Lq, F) bf16; k, v: (B, Lk, F) bf16; residual: (B, Lq, F) bf16;
    key_padding_mask: (B, Lk) bool (True = padded key).  Grid = (B, Lq-tiles).
    Returns the (B, Lq, F) bf16 stream and, if need_probs, the head-mean
    probabilities (B, Lq, Lk) in bf16 (exact softmax normalization)."""
    B, Lq, F = q.shape
    Lk = k.shape[1]
    D = F // n_heads
    scale = float(1.0 / (D ** 0.5))
    tq = _row_tile(Lq)
    grid = (B, Lq // tq)
    # (B, 1, Lk) additive bias; broadcast over heads / query rows happens in-kernel.
    bias = jnp.where(key_padding_mask[:, None, :], NEG_INF, 0.0).astype(jnp.float32)

    in_specs = [
        pl.BlockSpec((1, 1, Lk), lambda b, qi: (b, 0, 0)),
        pl.BlockSpec((1, tq, F), lambda b, qi: (b, qi, 0)),
        pl.BlockSpec((1, Lk, F), lambda b, qi: (b, 0, 0)),
        pl.BlockSpec((1, Lk, F), lambda b, qi: (b, 0, 0)),
        pl.BlockSpec((1, tq, F), lambda b, qi: (b, qi, 0)),
        pl.BlockSpec((F, F), lambda b, qi: (0, 0)),
        pl.BlockSpec((1, F), lambda b, qi: (0, 0)),
        pl.BlockSpec((1, F), lambda b, qi: (0, 0)),
        pl.BlockSpec((1, F), lambda b, qi: (0, 0)),
    ]
    args = (bias, q, k, v, residual, w_o, b_o, ln["g"], ln["b"])

    if need_probs:
        kern = functools.partial(_attn_probs_kernel, scale=scale, n_heads=n_heads,
                                 head_dim=D)
        out, pmean = pl.pallas_call(
            kern, grid=grid, in_specs=in_specs,
            out_specs=(pl.BlockSpec((1, tq, F), lambda b, qi: (b, qi, 0)),
                       pl.BlockSpec((1, tq, Lk), lambda b, qi: (b, qi, 0))),
            out_shape=(jax.ShapeDtypeStruct((B, Lq, F), jnp.bfloat16),
                       jax.ShapeDtypeStruct((B, Lq, Lk), jnp.bfloat16)),
            scratch_shapes=[pltpu.VMEM((tq, F), jnp.bfloat16),
                            pltpu.VMEM((tq, Lk), jnp.float32)],
            compiler_params=_cparams(2),
        )(*args)
        return out, pmean

    kern = functools.partial(_attn_kernel, scale=scale, n_heads=n_heads, head_dim=D)
    out = pl.pallas_call(
        kern, grid=grid, in_specs=in_specs,
        out_specs=pl.BlockSpec((1, tq, F), lambda b, qi: (b, qi, 0)),
        out_shape=jax.ShapeDtypeStruct((B, Lq, F), jnp.bfloat16),
        scratch_shapes=[pltpu.VMEM((tq, F), jnp.bfloat16)],
        compiler_params=_cparams(2),
    )(*args)
    return out


# ----------------------------- BiEncoder layer / stack -----------------------------

def bi_encoder_layer(vis, pos, padding_mask, text, text_padding_mask, p, n_heads,
                     end_points):
    B, Lv, F = vis.shape
    Lt = text.shape[1]
    vis2d = vis.reshape(B * Lv, F)
    text2d = text.reshape(B * Lt, F)

    # ---- vision self-attention (positional embeddings added to q/k, not v) ----
    sp = p["self_v"]
    vispos2d = (vis + pos).reshape(B * Lv, F)
    qv, kv = linear_multi(vispos2d, sp["w_qk"], sp["b_qk"], 2)
    (vv,) = linear_multi(vis2d, sp["w_v"], sp["b_v"], 1)
    vis = attention_block(qv.reshape(B, Lv, F), kv.reshape(B, Lv, F),
                          vv.reshape(B, Lv, F), vis, padding_mask,
                          sp["w_o"], sp["b_o"], p["ln_self_v"], n_heads)
    vis2d = vis.reshape(B * Lv, F)

    # ---- language self-attention (fully fused q|k|v projection) ----
    st = p["self_t"]
    qt, kt, vt = linear_multi(text2d, st["w_qkv"], st["b_qkv"], 3)
    text = attention_block(qt.reshape(B, Lt, F), kt.reshape(B, Lt, F),
                           vt.reshape(B, Lt, F), text, text_padding_mask,
                           st["w_o"], st["b_o"], p["ln_self_t"], n_heads)
    text2d = text.reshape(B * Lt, F)

    # ---- shared projections feeding BOTH cross attentions, grouped by input ----
    vispos2d = (vis + pos).reshape(B * Lv, F)
    q_vl, k_lv = linear_multi(vispos2d, p["cross_from_vispos"]["w"],
                              p["cross_from_vispos"]["b"], 2)
    k_vl, v_vl, q_lv = linear_multi(text2d, p["cross_from_text"]["w"],
                                    p["cross_from_text"]["b"], 3)
    (v_lv,) = linear_multi(vis2d, p["cross_from_vis"]["w"],
                           p["cross_from_vis"]["b"], 1)

    # ---- cross attention: vision attends to language ----
    cvo = p["cross_vl_out"]
    vis_new = attention_block(q_vl.reshape(B, Lv, F), k_vl.reshape(B, Lt, F),
                              v_vl.reshape(B, Lt, F), vis, text_padding_mask,
                              cvo["w_o"], cvo["b_o"], p["ln_cross_v"], n_heads)

    # ---- cross attention: language attends to vision (records lv_attention) ----
    clo = p["cross_lv_out"]
    text_new, lv_attn = attention_block(q_lv.reshape(B, Lt, F), k_lv.reshape(B, Lv, F),
                                        v_lv.reshape(B, Lv, F), text, padding_mask,
                                        clo["w_o"], clo["b_o"], p["ln_cross_t"],
                                        n_heads, need_probs=True)
    end_points["lv_attention"] = lv_attn                     # (B, Lt, Lv) head-mean

    # ---- feed-forward on each stream (fused FFN + residual + LayerNorm) ----
    vis = ffn_add_ln(vis_new.reshape(B * Lv, F), p["ffn_v"], p["ln_ffn_v"])
    text = ffn_add_ln(text_new.reshape(B * Lt, F), p["ffn_t"], p["ln_ffn_t"])
    return vis.reshape(B, Lv, F), text.reshape(B, Lt, F)


def bi_encoder_forward(layer_params, vis_feats, pos_feats, padding_mask, text_feats,
                       text_padding_mask, n_heads, end_points,
                       detected_feats=None, detected_mask=None):
    """Mirrors BiEncoder.forward: loop over layers, record per-layer lv_attention."""
    # Inter-kernel activations travel in bf16 (f32 math inside kernels).
    vis = vis_feats.astype(jnp.bfloat16)
    pos = pos_feats.astype(jnp.bfloat16)
    text = text_feats.astype(jnp.bfloat16)
    for i, p in enumerate(layer_params):
        vis, text = bi_encoder_layer(vis, pos, padding_mask, text, text_padding_mask,
                                     p, n_heads, end_points)
        if "lv_attention" in end_points:
            end_points["lv_attention%d" % i] = end_points["lv_attention"]
    return vis.astype(vis_feats.dtype), text.astype(text_feats.dtype)


# ----------------------------- deterministic parameter init -----------------------------

def _init_lin(key, d_in, d_out):
    w = (jax.random.normal(key, (d_in, d_out), jnp.float32) * 0.02).astype(jnp.bfloat16)
    b = jnp.zeros((1, d_out), jnp.float32)
    return w, b


def _init_ln(d_model):
    return dict(g=jnp.ones((1, d_model), jnp.float32),
                b=jnp.zeros((1, d_model), jnp.float32))


def _init_ffn(key, d_model, d_ff):
    k1, k2 = jax.random.split(key)
    w1, b1 = _init_lin(k1, d_model, d_ff)
    w2, b2 = _init_lin(k2, d_ff, d_model)
    return dict(w1=w1, b1=b1, w2=w2, b2=b2)


def init_bi_encoder_params(key, num_layers, d_model, d_ff):
    F = d_model
    params = []
    for i in range(num_layers):
        lk = jax.random.fold_in(key, i)
        ks = jax.random.split(lk, 12)
        w_qk, b_qk = _init_lin(ks[0], F, 2 * F)      # vision self-attn q|k (on vis+pos)
        w_v, b_v = _init_lin(ks[1], F, F)            # vision self-attn v
        w_so, b_so = _init_lin(ks[2], F, F)
        w_qkv, b_qkv = _init_lin(ks[3], F, 3 * F)    # text self-attn q|k|v
        w_to, b_to = _init_lin(ks[4], F, F)
        w_cvp, b_cvp = _init_lin(ks[5], F, 2 * F)    # vis+pos -> (q for V<-L | k for L<-V)
        w_ctx, b_ctx = _init_lin(ks[6], F, 3 * F)    # text    -> (k | v for V<-L | q for L<-V)
        w_cv, b_cv = _init_lin(ks[7], F, F)          # vis     ->  v for L<-V
        w_vlo, b_vlo = _init_lin(ks[8], F, F)
        w_lvo, b_lvo = _init_lin(ks[9], F, F)
        params.append(dict(
            self_v=dict(w_qk=w_qk, b_qk=b_qk, w_v=w_v, b_v=b_v, w_o=w_so, b_o=b_so),
            self_t=dict(w_qkv=w_qkv, b_qkv=b_qkv, w_o=w_to, b_o=b_to),
            cross_from_vispos=dict(w=w_cvp, b=b_cvp),
            cross_from_text=dict(w=w_ctx, b=b_ctx),
            cross_from_vis=dict(w=w_cv, b=b_cv),
            cross_vl_out=dict(w_o=w_vlo, b_o=b_vlo),
            cross_lv_out=dict(w_o=w_lvo, b_o=b_lvo),
            ffn_v=_init_ffn(ks[10], d_model, d_ff),
            ffn_t=_init_ffn(ks[11], d_model, d_ff),
            ln_self_v=_init_ln(d_model), ln_self_t=_init_ln(d_model),
            ln_cross_v=_init_ln(d_model), ln_cross_t=_init_ln(d_model),
            ln_ffn_v=_init_ln(d_model), ln_ffn_t=_init_ln(d_model),
        ))
    return params


# ----------------------------- demo -----------------------------

if __name__ == "__main__":
    B, N_VIS, N_TEXT, D_MODEL, N_HEADS, D_FF, NUM_LAYERS = 2, 16, 8, 32, 4, 32, 2

    root = jax.random.PRNGKey(0)
    k_params, k_vis, k_pos, k_text = jax.random.split(root, 4)

    layer_params = init_bi_encoder_params(k_params, NUM_LAYERS, D_MODEL, D_FF)

    vis_feats = jax.random.normal(k_vis, (B, N_VIS, D_MODEL), jnp.float32)
    pos_feats = jax.random.normal(k_pos, (B, N_VIS, D_MODEL), jnp.float32)
    text_feats = jax.random.normal(k_text, (B, N_TEXT, D_MODEL), jnp.float32)

    # True = padded position (ignored as attention key)
    padding_mask = jnp.zeros((B, N_VIS), jnp.bool_).at[1, 12:].set(True)
    text_padding_mask = jnp.zeros((B, N_TEXT), jnp.bool_).at[0, 6:].set(True)

    end_points = {}
    vis_out, text_out = bi_encoder_forward(
        layer_params, vis_feats, pos_feats, padding_mask,
        text_feats, text_padding_mask, N_HEADS, end_points)

    jax.block_until_ready((vis_out, text_out))
    assert vis_out.shape == (B, N_VIS, D_MODEL)
    assert text_out.shape == (B, N_TEXT, D_MODEL)
    assert "lv_attention0" in end_points and "lv_attention1" in end_points
    assert end_points["lv_attention0"].shape == (B, N_TEXT, N_VIS)
    assert bool(jnp.all(jnp.isfinite(vis_out))) and bool(jnp.all(jnp.isfinite(text_out)))
    assert bool(jnp.all(jnp.isfinite(end_points["lv_attention0"].astype(jnp.float32))))
    print("KERNEL_OK")
</pallas_src>

<mosaic_0001>
module attributes {stable_mosaic.version = 11 : i64} {
  func.func @_proj_kernel(%arg0: i32, %arg1: memref<16x32xbf16, #tpu.memory_space<vmem>>, %arg2: memref<32x64xbf16, #tpu.memory_space<vmem>>, %arg3: memref<1x64xf32, #tpu.memory_space<vmem>>, %arg4: memref<16x32xbf16, #tpu.memory_space<vmem>>, %arg5: memref<16x32xbf16, #tpu.memory_space<vmem>>) attributes {dimension_semantics = [#tpu.dimension_semantics<parallel>], iteration_bounds = array<i64: 2>, scalar_prefetch = 0 : i64, scratch_operands = 0 : i64, tpu.core_type = #tpu.core_type<tc>, window_params = [{transform_indices = @transform_0, window_bounds = array<i64: 16, 32>}, {pipeline_mode = #tpu.pipeline_mode<synchronous>, transform_indices = @transform_1, window_bounds = array<i64: 32, 64>}, {pipeline_mode = #tpu.pipeline_mode<synchronous>, transform_indices = @transform_2, window_bounds = array<i64: 1, 64>}, {transform_indices = @transform_3, window_bounds = array<i64: 16, 32>}, {transform_indices = @transform_4, window_bounds = array<i64: 16, 32>}]} {
    %c0 = arith.constant 0 : index
    %c0_0 = arith.constant 0 : index
    %0 = vector.load %arg1[%c0, %c0_0] : memref<16x32xbf16, #tpu.memory_space<vmem>>, vector<16x32xbf16>
    %c0_1 = arith.constant 0 : index
    %c0_2 = arith.constant 0 : index
    %1 = vector.load %arg2[%c0_1, %c0_2] : memref<32x64xbf16, #tpu.memory_space<vmem>>, vector<32x64xbf16>
    %cst = arith.constant dense<0.000000e+00> : vector<16x64xf32>
    %2 = tpu.matmul %0, %1, %cst {dimension_numbers = #tpu.dot_dimension_numbers<[1], [0], [0], [1], [0, 0, 1, 1], [], []>} : vector<16x32xbf16>, vector<32x64xbf16>, vector<16x64xf32> -> vector<16x64xf32>
    %c0_3 = arith.constant 0 : index
    %c0_4 = arith.constant 0 : index
    %3 = vector.load %arg3[%c0_3, %c0_4] : memref<1x64xf32, #tpu.memory_space<vmem>>, vector<1x64xf32>
    %4 = vector.broadcast %3 : vector<1x64xf32> to vector<16x64xf32>
    %5 = arith.addf %2, %4 : vector<16x64xf32>
    %6 = vector.extract_strided_slice %5 {offsets = [0, 0], sizes = [16, 32], strides = [1, 1]} : vector<16x64xf32> to vector<16x32xf32>
    %7 = arith.truncf %6 : vector<16x32xf32> to vector<16x32xbf16>
    %c0_5 = arith.constant 0 : index
    %c0_6 = arith.constant 0 : index
    %8 = vector.load %arg4[%c0_5, %c0_6] : memref<16x32xbf16, #tpu.memory_space<vmem>>, vector<16x32xbf16>
    tpu.vector_store %arg4[%c0_5, %c0_6], %7 {strides = array<i32>} : memref<16x32xbf16, #tpu.memory_space<vmem>>, vector<16x32xbf16>,
    %9 = vector.extract_strided_slice %5 {offsets = [0, 32], sizes = [16, 32], strides = [1, 1]} : vector<16x64xf32> to vector<16x32xf32>
    %10 = arith.truncf %9 : vector<16x32xf32> to vector<16x32xbf16>
    %c0_7 = arith.constant 0 : index
    %c0_8 = arith.constant 0 : index
    %11 = vector.load %arg5[%c0_7, %c0_8] : memref<16x32xbf16, #tpu.memory_space<vmem>>, vector<16x32xbf16>
    tpu.vector_store %arg5[%c0_7, %c0_8], %10 {strides = array<i32>} : memref<16x32xbf16, #tpu.memory_space<vmem>>, vector<16x32xbf16>,
    return
  }
  func.func @transform_0(%arg0: i32) -> (i32, i32) {
    %c0_i32 = arith.constant 0 : i32
    %c0_i32_0 = arith.constant 0 : i32
    return %arg0, %c0_i32 : i32, i32
  }
  func.func @transform_1(%arg0: i32) -> (i32, i32) {
    %c0_i32 = arith.constant 0 : i32
    %c0_i32_0 = arith.constant 0 : i32
    %c0_i32_1 = arith.constant 0 : i32
    return %c0_i32, %c0_i32_0 : i32, i32
  }
  func.func @transform_2(%arg0: i32) -> (i32, i32) {
    %c0_i32 = arith.constant 0 : i32
    %c0_i32_0 = arith.constant 0 : i32
    %c0_i32_1 = arith.constant 0 : i32
    return %c0_i32, %c0_i32_0 : i32, i32
  }
  func.func @transform_3(%arg0: i32) -> (i32, i32) {
    %c0_i32 = arith.constant 0 : i32
    %c0_i32_0 = arith.constant 0 : i32
    return %arg0, %c0_i32 : i32, i32
  }
  func.func @transform_4(%arg0: i32) -> (i32, i32) {
    %c0_i32 = arith.constant 0 : i32
    %c0_i32_0 = arith.constant 0 : i32
    return %arg0, %c0_i32 : i32, i32
  }
}

</mosaic_0001>

<bundles_post_ra>
// kernel: tpu_custom_call.1
= control target key start
LH: loop header
LB: loop body
LE: loop exit
PB: predicated region body
PF: predicated region fallthrough
CT: control target
= control target key end

     0   :  { %10 = vsyncpa [#allocation3], 0  ;;  %s1065_s0 = inlined_call_operand.hbm [shape: bf16[32,32], index: 0, kind: input, shape index: {}]   ;;  %s1066_s1 = inlined_call_operand.hbm [shape: bf16[32,64], index: 1, kind: input, shape index: {}]   ;;  %s1067_s2 = inlined_call_operand.vmem [shape: f32[1,64], index: 2, kind: input, shape index: {}]   ;;  %s1068_s3 = inlined_call_operand.hbm [shape: bf16[32,32], index: 3, kind: output, shape index: {0}]   ;;  %s1069_s4 = inlined_call_operand.hbm [shape: bf16[32,32], index: 4, kind: output, shape index: {1}]  }
   0x1   :  { %12 = vsyncpa [#allocation3 + $0x1], 0 }
   0x2   :  { %13 = vsyncpa [#allocation6], 0 }
   0x3   :  { %14 = vsyncpa [#allocation4], 0 }
   0x4   :  { %16 = vsyncpa [#allocation4 + $0x1], 0 }
   0x5   :  { %17 = vsyncpa [#allocation9], 0 }
   0x6   :  { %19 = vsyncpa [#allocation9 + $0x1], 0  ;;  %s803_s15 = smov 0   ;;  %s805_s16 = smov 0  }
   0x7   :  { %s807_s17 = smov 0   ;;  %s809_s18 = smov 0  }
   0x8 LB: > { %s824_s19 = sadd.s32 4294967295, %s765_s18   ;;  %s490_s20 = sadd.s32 4294967294, %s765_s18   ;;  %s765_s18 = sphi %s809_s18, %s1089_s18   ;;  %s761_s17 = sphi %s807_s17, %s1088_s17   ;;  %s757_s16 = sphi %s805_s16, %s1087_s16   ;;  %s753_s15 = sphi %s803_s15, %s1086_s15  }
   0x9   : > { %p45_p0 = scmp.ne.s32.totalorder %s757_s16, %s753_s15  ;;  %p1070_p1 = scmp.eq.s32.totalorder %s824_s19, 0 }
   0xa   : > { %p117_p3 = scmp.eq.s32.totalorder %s490_s20, 1  ;;  %p491_p5 = scmp.ge.s32.totalorder %s765_s18, 1 }
   0xb   : > { %p833_p4 = por %p1070_p1, %p45_p0  ;;  %p150_p7 = scmp.lt.s32.totalorder %s765_s18, 3 }
   0xc   : > { %p838_p6 = por %p117_p3, %p45_p0  ;;  %s767_s24 = smov [#allocation5]  }
   0xd   : > { %s1073_s21 = scalar_select %p833_p4, 1, 0 }
   0xe   : > { %s1074_s22 = scalar_select %p838_p6, 1, 0 }
   0xf   : > { %p843_p8 = pnand %p491_p5, %p150_p7  ;;  %s162_s25 = sshll.u32 %s767_s24, 4  ;;  %s847_s25 = int_to_ptr.vmem [resolvable:$true] %s162_s25 }
  0x10   : > { %s859_s27 = sadd.s32 1, %s765_s18   ;;  %s32_s28 = sadd.s32 1, %s761_s17 }
  0x11   : > { %s1075_s23 = scalar_select %p843_p8, 1, 0 }
  0x12   : > { %p543_p9 = pneg %p843_p8  ;;  %s29_s29 = ssub.s32 %s765_s18, %s859_s27 }
  0x13   : > { %s605_s6 = scalar_lea.hbm %s1066_s1, 256 }
  0x14   : > { %p854_p11 = pnand %p543_p9, %p1070_p1  ;;  %p606_p12 = scmp.ne.s32.totalorder %s1066_s1, %s605_s6 }
  0x15   : > { %p612_p5 = scmp.lt.u32.totalorder %s605_s6, %s1066_s1 }
  0x16   : > { %p607_p13 = pneg %p854_p11 }
  0x18   : > { %p608_p0 = pnand %p607_p13, %p606_p12 }
  0x1a   : > { %p609_p3 = pneg %p608_p0 }
  0x1c   : > { %p614_p7 = pnand %p612_p5, %p609_p3 }
  0x1e   : > { %617 = shalt.err (!%p614_p7)
}
  0x1f   : > { %s618_s11 = scalar_lea.vmem %s847_s25, 256  ;;  %p626_p2 = scmp.lt.s32.totalorder %s847_s25, %s847_s25 }
  0x20   : > { %p619_p9 = scmp.ne.s32.totalorder %s847_s25, %s618_s11  ;;  %p627_p6 = scmp.lt.s32.totalorder %s618_s11, %s618_s11 }
  0x22   : > { %p621_p10 = pnand %p619_p9, %p607_p13  ;;  %p628_p4 = por %p627_p6, %p626_p2 }
  0x24   : > { %p622_p1 = pneg %p621_p10 }
  0x26   : > { %p629_p8 = pnand %p628_p4, %p622_p1 }
  0x28   : > { %632 = shalt.err (!%p629_p8)
}
  0x29   : > { %s768_s12 = smov 64   ;;  %s769_s13 = smov 4  }
  0x2a   : > { %546 = dma.hbm_to_vmem [thread:$0]  (!%p854_p11), %s1066_s1, 256, %s847_s25, [#allocation6], %s768_s12, %s768_s12, %s769_s13  }
  0x2b   : > { %p30_p1 = scmp.eq.s32.totalorder %s29_s29, 0  ;;  %p39_p2 = scmp.ne.s32.totalorder %s761_s17, %s757_s16 }
  0x2c   : > { %p40_p4 = scmp.eq.s32.totalorder %s765_s18, 0  ;;  %p559_p6 = scmp.lt.s32.totalorder %s765_s18, 2 }
  0x2d   : > { %s893_s24 = scalar_select %p30_p1, %s761_s17, %s32_s28  }
  0x2e   : > { %p41_p8 = por %p40_p4, %p39_p2  ;;  %p1077_p10 = scmp.eq.s32.totalorder %s824_s19, 1 }
  0x2f   : > { %s179_s26 = sand.u32 1, %s761_s17   ;;  %s517_s5 = sshll.u32 %s765_s18, 7 }
  0x30   : > { %p897_p12 = por %p1077_p10, %p39_p2  ;;  %s494_s6 = sshll.u32 %s179_s26, 3 }
  0x31   : > { %s906_s9 = scalar_lea.hbm %s1065_s0, %s517_s5  ;;  %s183_s25 = scalar_lea.vmem [#allocation2], %s494_s6 }
  0x32   : > { %s190_s28 = sshll.u32 %s183_s25, 4  ;;  %p908_p11 = pnand %p559_p6, %p41_p8  ;;  %s912_s28 = int_to_ptr.vmem [resolvable:$true] %s190_s28 }
  0x33   : > { %s914_s10 = scalar_lea.sflag [#allocation3], %s179_s26  ;;  %s633_s11 = scalar_lea.hbm %s906_s9, 128 }
  0x34   : > { %p634_p13 = scmp.ne.s32.totalorder %s906_s9, %s633_s11  ;;  %p635_p0 = pneg %p908_p11 }
  0x35   : > { %s638_s5 = scalar_lea.hbm %s1065_s0, 256  ;;  %p639_p7 = scmp.lt.u32.totalorder %s906_s9, %s1065_s0 }
  0x36   : > { %p636_p3 = pnand %p635_p0, %p634_p13  ;;  %p640_p9 = scmp.lt.u32.totalorder %s638_s5, %s633_s11 }
  0x37   : > { %p642_p2 = scmp.lt.u32.totalorder %s633_s11, %s906_s9 }
  0x38   : > { %p637_p5 = pneg %p636_p3  ;;  %p641_p1 = por %p640_p9, %p639_p7 }
  0x3a   : > { %p643_p4 = por %p642_p2, %p641_p1 }
  0x3c   : > { %p644_p6 = pnand %p643_p4, %p637_p5 }
  0x3e   : > { %647 = shalt.err (!%p644_p6)
}
  0x3f   : > { %s648_s26 = scalar_lea.vmem %s912_s28, 128  ;;  %s770_s8 = smov [#allocation2]  }
  0x40   : > { %p649_p8 = scmp.ne.s32.totalorder %s912_s28, %s648_s26  ;;  %s653_s25 = sshll.u32 %s770_s8, 4  ;;  %s654_s25 = int_to_ptr.vmem [resolvable:$false] %s653_s25 }
  0x41   : > { %s655_s14 = scalar_lea.vmem %s654_s25, 256  ;;  %p656_p3 = scmp.lt.s32.totalorder %s912_s28, %s654_s25 }
  0x42   : > { %p651_p10 = pnand %p649_p8, %p635_p0  ;;  %p657_p7 = scmp.lt.s32.totalorder %s655_s14, %s648_s26 }
  0x44   : > { %p652_p13 = pneg %p651_p10  ;;  %p658_p9 = por %p657_p7, %p656_p3 }
  0x46   : > { %p659_p1 = pnand %p658_p9, %p652_p13 }
  0x48   : > { %662 = shalt.err (!%p659_p1)
}
  0x49   : > { %550 = dma.hbm_to_vmem [thread:$0]  (!%p908_p11), %s906_s9, 128, %s912_s28, %s914_s10, %s768_s12, %s768_s12, %s769_s13  }
  0x4a   : > { %p1080_p0 = scmp.ne.s32.totalorder %s1075_s23, 0 }
  0x4b   : > { %s948_s11 = sand.u32 (!%p1080_p0), 1, %s757_s16   ;;  %p1081_p5 = scmp.ne.s32.totalorder (!%p1080_p0), %s1073_s21, 0 }
  0x4c   : > { %202 = sbr.rel (%p1080_p0) target bundleno = 456 (0x1c8), region = 32  ;;  %s951_s20 = sshll.u32 (!%p1080_p0), %s948_s11, 3 }
  0x4d   : > { %s205_s29 = scalar_lea.sflag (!%p1080_p0), [#allocation3], %s948_s11  ;;  %s208_s5 = scalar_lea.vmem (!%p1080_p0), [#allocation2], %s951_s20 }
  0x53   : > { %736 = dma.done.wait (%p1081_p5), %s205_s29, 128  }
  0x54   : > { %738 = vsyncadd (%p1081_p5), %s205_s29, 4294967168  ;;  %p1082_p11 = scmp.eq.s32.totalorder %s824_s19, 0 }
  0x56   : > { %740 = dma.done.wait (%p1082_p11), [#allocation6], 256   ;;  %p1083_p2 = pmov %p1082_p11 }
  0x57   : > { %v771_v0 = vmov 0.0   ;;  %vm772_vm0 = vmmov 0   ;;  %v602_v1 = vld [vmem:[#allocation5] sm:$0xff]   ;;  %v603_v2 = vld [vmem:[#allocation5 + $0x8] sm:$0xff]   ;;  %v604_v3 = vld [vmem:[%s208_s5] sm:$0xff]   ;;  %vm276_vm1 = vcmask 261120  }
  0x58   : > { %742 = vsyncadd (%p1083_p2), [#allocation6], 4294967040  ;;  %525 = vmatprep.subr.bf16.mxu0 %v771_v0  ;;  %529 = vmatprep.mubr.msk.bf16.mxu0 %vm772_vm0, %v771_v0  ;;  %v502_v4 = vld [vmem:[%s1067_s2] ss:$0 sm:$0xff]  ;;  %s520_s12 = sshll.u32 %s824_s19, 7  ;;  %s234_s13 = scalar_lea.vmem [#allocation7], %s951_s20 }
  0x59   : > { %526 = vmatpush3.bf16.msra.mxu0 %v602_v1  ;;  %s359_s9 = sshll.u32 %s234_s13, 4  ;;  %vm329_vm2 = vcmask 257024   ;;  %s973_s6 = scalar_lea.hbm %s1068_s3, %s520_s12  ;;  %s975_s9 = int_to_ptr.vmem [resolvable:$true] %s359_s9 }
  0x5a   : > { %527 = vmatprep.subr.bf16.mxu0 %v771_v0  ;;  %s773_s7 = smov 96   ;;  %s341_s26 = scalar_lea.sflag [#allocation4], %s948_s11 }
  0x5b   : > { %s663_s8 = scalar_lea.vmem %s975_s9, 128  ;;  %s774_s25 = smov [#allocation7]  }
  0x5c   : > { %p664_p4 = scmp.ne.s32.totalorder %s975_s9, %s663_s8  ;;  %s667_s14 = sshll.u32 %s774_s25, 4  ;;  %s668_s14 = int_to_ptr.vmem [resolvable:$false] %s667_s14 }
  0x5d   : > { %528 = vmatpush3.bf16.msra.mxu0 %v603_v2  ;;  %s669_s29 = scalar_lea.vmem %s668_s14, 256  ;;  %p670_p10 = scmp.lt.s32.totalorder %s975_s9, %s668_s14 }
  0x5e   : > { %p665_p6 = pnand %p664_p4, %p897_p12  ;;  %p671_p13 = scmp.lt.s32.totalorder %s669_s29, %s663_s8 }
  0x60   : > { %530 = vmatmul.mubr.msk.bf16.vlgmr.msra.gmra.mrb[0].mxu0 %vm276_vm1, %v604_v3  ;;  %p666_p8 = pneg %p665_p6  ;;  %p672_p3 = por %p671_p13, %p670_p10 }
  0x62   : > { %p673_p7 = pnand %p672_p3, %p666_p8 }
 0x133   : > { %v314_v5 = vpop.f32.mrb[0].mxu0 }
 0x134   : > { %v315_v6 = vadd.f32 %v502_v4, %v314_v5  ;;  %v531_v7 = vpop.f32.mrb[1].mxu0 }
 0x135   : > { %v317_v8 = vpop.f32.mrb[2].mxu0 }
 0x136   : > { %v518_v9 = vpack.c.bf16 %v315_v6, %v315_v6  ;;  %v318_v10 = vadd.f32 %v502_v4, %v317_v8  ;;  %v532_v11 = vpop.f32.mrb[3].mxu0 }
 0x138   : > { %v519_v12 = vpack.c.bf16 %v318_v10, %v318_v10  ;;  %332 = vrot.lane.b32.xlu0 %v518_v9, %s773_s7  ;;  %330 = vst.msk [vmem:[%s234_s13] sm:$0xf] %vm329_vm2, %v518_v9 }
 0x13a   : > { %331 = vst.msk [vmem:[%s234_s13 + $0x4] sm:$0xf] %vm329_vm2, %v519_v12 }
 0x13b   : > { %676 = shalt.err (!%p673_p7)
}
 0x13c   : > { %s677_s5 = scalar_lea.hbm %s973_s6, 128  ;;  %s681_s13 = scalar_lea.hbm %s1068_s3, 256 }
 0x13d   : > { %p678_p9 = scmp.ne.s32.totalorder %s973_s6, %s677_s5  ;;  %p682_p5 = scmp.lt.u32.totalorder %s973_s6, %s1068_s3 }
 0x13e   : > { %p683_p11 = scmp.lt.u32.totalorder %s681_s13, %s677_s5  ;;  %p685_p4 = scmp.lt.u32.totalorder %s677_s5, %s973_s6 }
 0x13f   : > { %p679_p1 = pnand %p678_p9, %p897_p12 }
 0x140   : > { %p684_p2 = por %p683_p11, %p682_p5 }
 0x141   : > { %p680_p0 = pneg %p679_p1 }
 0x142   : > { %p686_p6 = por %p685_p4, %p684_p2 }
 0x144   : > { %p687_p8 = pnand %p686_p6, %p680_p0 }
 0x146   : > { %690 = shalt.err (!%p687_p8)
}
 0x147   : > { %s775_s8 = smov 64   ;;  %s776_s25 = smov 4   ;;  %334 = vrot.lane.b32.xlu0 %v519_v12, %s773_s7 }
 0x148   : > { %539 = dma.vmem_to_hbm [thread:$0]  (%p897_p12), %s975_s9, 128, %s973_s6, %s341_s26, %s775_s8, %s775_s8, %s776_s25  }
 0x149   : > { %s241_s14 = scalar_lea.vmem [#allocation8], %s951_s20  ;;  %s1017_s23 = scalar_lea.hbm %s1069_s4, %s520_s12 }
 0x14a   : > { %s375_s29 = sshll.u32 %s241_s14, 4  ;;  %s346_s9 = scalar_lea.sflag [#allocation9], %s948_s11  ;;  %s1010_s29 = int_to_ptr.vmem [resolvable:$true] %s375_s29 }
 0x14b   : > { %s691_s20 = scalar_lea.vmem %s1010_s29, 128  ;;  %s777_s6 = smov [#allocation8]  }
 0x14c   : > { %p692_p10 = scmp.ne.s32.totalorder %s1010_s29, %s691_s20  ;;  %s695_s7 = sshll.u32 %s777_s6, 4  ;;  %s696_s7 = int_to_ptr.vmem [resolvable:$false] %s695_s7 }
 0x14d   : > { %s697_s19 = scalar_lea.vmem %s696_s7, 256  ;;  %p698_p7 = scmp.lt.s32.totalorder %s1010_s29, %s696_s7 }
 0x14e   : > { %p693_p13 = pnand %p692_p10, %p897_p12  ;;  %p699_p9 = scmp.lt.s32.totalorder %s697_s19, %s691_s20 }
 0x150   : > { %p694_p3 = pneg %p693_p13  ;;  %p700_p1 = por %p699_p9, %p698_p7 }
 0x152   : > { %p701_p0 = pnand %p700_p1, %p694_p3 }
 0x1aa   : > { %v333_v13 = vpop.permute.xlu0 %332 }
 0x1ab   : > { %338 = vst.msk [vmem:[%s241_s14] sm:$0xf] %vm329_vm2, %v333_v13 }
 0x1b9   : > { %v335_v14 = vpop.permute.xlu0 %334 }
 0x1ba   : > { %339 = vst.msk [vmem:[%s241_s14 + $0x4] sm:$0xf] %vm329_vm2, %v335_v14 }
 0x1bb   : > { %704 = shalt.err (!%p701_p0)
}
 0x1bc   : > { %s705_s12 = scalar_lea.hbm %s1017_s23, 128  ;;  %s709_s28 = scalar_lea.hbm %s1069_s4, 256 }
 0x1bd   : > { %p706_p5 = scmp.ne.s32.totalorder %s1017_s23, %s705_s12  ;;  %p710_p4 = scmp.lt.u32.totalorder %s1017_s23, %s1069_s4 }
 0x1be   : > { %p711_p6 = scmp.lt.u32.totalorder %s709_s28, %s705_s12  ;;  %p713_p10 = scmp.lt.u32.totalorder %s705_s12, %s1017_s23 }
 0x1bf   : > { %p707_p11 = pnand %p706_p5, %p897_p12 }
 0x1c0   : > { %p712_p8 = por %p711_p6, %p710_p4 }
 0x1c1   : > { %p708_p2 = pneg %p707_p11 }
 0x1c2   : > { %p714_p13 = por %p713_p10, %p712_p8 }
 0x1c4   : > { %p715_p3 = pnand %p714_p13, %p708_p2 }
 0x1c6   : > { %718 = shalt.err (!%p715_p3)
}
 0x1c7   : > { %540 = dma.vmem_to_hbm [thread:$0]  (%p897_p12), %s1010_s29, 128, %s1017_s23, %s346_s9, %s775_s8, %s775_s8, %s776_s25  }
 0x1c8 PF: > { %s390_s5 = sand.u32 1, %s753_s15   ;;  %p1084_p7 = scmp.ne.s32.totalorder %s1074_s22, 0 }
 0x1c9   : > { %p1085_p9 = scmp.ge.s32.totalorder %s765_s18, 2  ;;  %s391_s21 = scalar_lea.sflag [#allocation4], %s390_s5 }
 0x1cb   : > { %p552_p1 = pnand %p1085_p9, %p1084_p7 }
 0x1cd   : > { %744 = dma.done.wait (!%p552_p1), %s391_s21, 128  }
 0x1ce   : > { %746 = vsyncadd (!%p552_p1), %s391_s21, 4294967168  ;;  %s400_s30 = scalar_lea.sflag [#allocation9], %s390_s5 }
 0x1cf   : > { %748 = dma.done.wait (!%p552_p1), %s400_s30, 128  }
 0x1d0   : > { %750 = vsyncadd (!%p552_p1), %s400_s30, 4294967168  ;;  %p22_p12 = scmp.ge.s32.totalorder %s859_s27, 4   ;;  %s1086_s15 = smov %s757_s16 }
 0x1d1   : > { %s1087_s16 = smov %s761_s17  ;;  %s1088_s17 = smov %s893_s24 }
 0x1d2   : > { %s1089_s18 = smov %s859_s27  ;;  %24 = sbr.rel (!%p22_p12) target bundleno = 8 (0x8), region = 98 }
 0x1d9   :  { %405 = vsyncpa [#allocation3], 1 }
 0x1da   :  { %407 = vsyncpa [#allocation3 + $0x1], 1 }
 0x1db   :  { %408 = vsyncpa [#allocation6], 1 }
 0x1dc   :  { %409 = vsyncpa [#allocation4], 1 }
 0x1dd   :  { %411 = vsyncpa [#allocation4 + $0x1], 1 }
 0x1de   :  { %412 = vsyncpa [#allocation9], 1 }
 0x1df   :  { %414 = vsyncpa [#allocation9 + $0x1], 1 }

</bundles_post_ra>
